<compile_context>
chip_gen: v7x
topology: tpu7x:2x2x1
jax: 0.10.0
libtpu: 0.0.40
codegen_flags: <defaults>
</compile_context>

<pallas_src>
import functools

import jax
import jax.numpy as jnp
from jax.experimental import pallas as pl
from jax.experimental.pallas import tpu as pltpu


def _round_up(x, m):
    return (x + m - 1) // m * m


def _cdiv(a, b):
    return -(-a // b)


def _device_kind():
    try:
        return jax.devices()[0].device_kind.lower()
    except Exception:
        return ""


def _vmem_capacity_bytes(default=64 * 2**20):
    """Per-core VMEM capacity; conservative 64 MiB (fits every gen) if unknown."""
    try:
        info = pltpu.get_tpu_info()
        for name in ("vmem_capacity_bytes", "vmem_bytes", "vmem_size_bytes"):
            v = getattr(info, name, None)
            if v:
                return int(v)
    except Exception:
        pass
    return default


def _fold_8x128(x):
    """Fold an (R, C) f32 array (R%8==0, C%128==0) into an (8, 128) partial sum.

    The 4-D reshape matches the native (8, 128) vreg tiling exactly, so both
    reductions are plain vreg adds on the VPU -- no cross-lane XLU reduce and
    no scalar round trip per tile.
    """
    r, c = x.shape
    x4 = x.reshape(r // 8, 8, c // 128, 128)
    return x4.sum(axis=2).sum(axis=0)


def _disc_centroids_kernel(feat_ref, cgath_ref, cent_t_ref,
                           out_attract_ref, out_featsq_ref, out_cross_ref,
                           *, class_chunk):
    """One (TB, Dp) batch tile.

    feat_ref   : (TB, Dp) f32   features, zero-padded rows / feature columns
    cgath_ref  : (TB, Dp) f32   centroids[label] gathered per row (zero pad rows)
    cent_t_ref : (Dp, Cp) bf16  resident transposed centroids, zero-padded
    outputs    : (1, 8, 128) f32 per-split vreg-shaped accumulators:
                 attract = sum (f - c_y)^2,  featsq = sum ||f||^2,
                 cross   = sum_ij f_i . c_j
    """
    b = pl.program_id(1)

    @pl.when(b == 0)
    def _init():
        out_attract_ref[...] = jnp.zeros_like(out_attract_ref)
        out_featsq_ref[...] = jnp.zeros_like(out_featsq_ref)
        out_cross_ref[...] = jnp.zeros_like(out_cross_ref)

    feat = feat_ref[...]                                 # (TB, Dp) f32
    cgath = cgath_ref[...]                               # (TB, Dp) f32

    # Exact f32 attract partial (no expansion-form cancellation).
    diff = feat - cgath
    out_attract_ref[...] += _fold_8x128(diff * diff)[None]

    # sum_i ||f_i||^2 in f32 (padded rows/cols are zero -> contribute nothing).
    out_featsq_ref[...] += _fold_8x128(feat * feat)[None]

    # sum_ij f_i . c_j : bf16 MXU matmul over class chunks of the resident
    # table; each chunk's (TB, class_chunk) f32 result is folded straight into
    # an (8, 128) partial (vreg adds only).
    feat_bf = feat.astype(jnp.bfloat16)
    cp = cent_t_ref.shape[1]
    cross_part = jnp.zeros((8, 128), jnp.float32)
    for c0 in range(0, cp, class_chunk):
        cols = min(class_chunk, cp - c0)
        cross = jnp.dot(feat_bf, cent_t_ref[:, c0:c0 + cols],
                        preferred_element_type=jnp.float32)
        cross_part = cross_part + _fold_8x128(cross)
    out_cross_ref[...] += cross_part[None]


def disc_centroids_loss(feat, label, centroids, size_average=True, margin=10.0,
                        num_splits=None, max_tile_rows=None,
                        class_chunk_cols=2048, single_buffer_centroids=True):
    """JAX/Pallas forward pass reproducing DiscCentroidsLoss.forward."""
    batch = feat.shape[0]
    feat2d = feat.reshape(batch, -1).astype(jnp.float32)
    num_classes, feat_dim = centroids.shape
    if feat2d.shape[1] != feat_dim:
        raise ValueError(
            "Center's dim: {0} should be equal to input feature's dim: {1}".format(
                feat_dim, feat2d.shape[1]))

    # --- per-generation tuning knobs (review items 7-11) ---------------------
    kind = _device_kind()
    if num_splits is None:
        num_splits = 2 if "v7" in kind else 1          # only v7x has 2 TCs
    if max_tile_rows is None:
        if "v5 lite" in kind or "v5e" in kind:
            max_tile_rows = 256                        # v5e: f32-only VPU, spills earlier
        elif "v6" in kind:
            max_tile_rows = 1024                       # v6e: 128 MiB VMEM, big tiles
        else:
            max_tile_rows = 512
    pad = 256 if ("v6" in kind or "v7" in kind) else 128   # 256-wide MXU on v6e/v7x

    dp = _round_up(feat_dim, pad)
    cp = _round_up(num_classes, pad)
    class_chunk = min(cp, _round_up(max(class_chunk_cols, 128), 128))

    # --- tile sizing against the real working set (review items 1-3, 7) ------
    vmem_cap = _vmem_capacity_bytes()
    budget = int(vmem_cap * 0.75)                      # headroom below physical VMEM

    cent_buffers = 1 if single_buffer_centroids else 2
    cent_bytes = cent_buffers * dp * cp * 2            # resident bf16 centroid table

    per_row = (2 * dp * 4        # feat double buffer (f32)
               + 2 * dp * 4      # gathered-centroid double buffer (f32)
               + dp * 2          # bf16 cast of feat
               + 3 * dp * 4      # diff / diff^2 / feat^2 temporaries
               + 2 * class_chunk * 4)   # (TB, class_chunk) cross + fold temps
    # TODO(synk): for centroid tables larger than the VMEM budget, stream class
    #             tiles via a grid axis instead of keeping the table resident.
    avail = max(budget - cent_bytes - (1 << 20), per_row * 8)
    tb_cap = max(8, (avail // per_row) // 8 * 8)

    rows_per_split = _cdiv(batch, num_splits)
    tb = max(8, min(max_tile_rows, tb_cap, _round_up(rows_per_split, 8)) // 8 * 8)
    nb = _cdiv(rows_per_split, tb)
    padded_b = num_splits * nb * tb

    need = cent_bytes + tb * per_row + (1 << 20)
    vmem_limit = int(min(budget, max(int(need * 1.25), 32 * 2**20)))

    # --- wrapper-side inputs (pad only when actually needed, review item 6) --
    cent_f32 = centroids.astype(jnp.float32)
    cgath = cent_f32[label.astype(jnp.int32)]          # exact f32 gather (B, D)
    cent_sq_total = jnp.sum(cent_f32 * cent_f32)       # scalar sum_j ||c_j||^2

    if padded_b != batch or dp != feat_dim:
        pr, pc = padded_b - batch, dp - feat_dim
        feat_p = jnp.pad(feat2d, ((0, pr), (0, pc)))
        cgath_p = jnp.pad(cgath, ((0, pr), (0, pc)))
    else:
        feat_p, cgath_p = feat2d, cgath

    cent_t = cent_f32.T.astype(jnp.bfloat16)           # (D, C) bf16 for the MXU
    if dp != feat_dim or cp != num_classes:
        cent_t = jnp.pad(cent_t, ((0, dp - feat_dim), (0, cp - num_classes)))

    # --- pallas_call ----------------------------------------------------------
    kernel = functools.partial(_disc_centroids_kernel, class_chunk=class_chunk)
    out_shapes = (jax.ShapeDtypeStruct((num_splits, 8, 128), jnp.float32),) * 3
    out_block = pl.BlockSpec((1, 8, 128), lambda s, b: (s, 0, 0))
    stream_spec = pl.BlockSpec((tb, dp), lambda s, b: (s * nb + b, 0))

    def _cent_spec(single_buffer):
        if single_buffer:
            try:
                return pl.BlockSpec((dp, cp), lambda s, b: (0, 0),
                                    pipeline_mode=pl.Buffered(1))
            except TypeError:
                pass
        return pl.BlockSpec((dp, cp), lambda s, b: (0, 0))

    def _run(single_buffer):
        return pl.pallas_call(
            kernel,
            out_shape=out_shapes,
            grid_spec=pltpu.PrefetchScalarGridSpec(
                num_scalar_prefetch=0,
                grid=(num_splits, nb),
                in_specs=[stream_spec, stream_spec, _cent_spec(single_buffer)],
                out_specs=(out_block, out_block, out_block),
            ),
            compiler_params=pltpu.CompilerParams(
                dimension_semantics=("parallel", "arbitrary"),
                vmem_limit_bytes=vmem_limit),
        )(feat_p, cgath_p, cent_t)

    if single_buffer_centroids:
        try:
            out_a, out_f, out_x = _run(True)
        except Exception:
            # pl.Buffered(1) unsupported by this jax/Mosaic build: fall back to
            # default double-buffered resident table (identical semantics).
            out_a, out_f, out_x = _run(False)
    else:
        out_a, out_f, out_x = _run(False)

    # --- final scalar combine (closed-form repel, review item 4) --------------
    attract_sum = jnp.sum(out_a)
    featsq_sum = jnp.sum(out_f)
    cross_sum = jnp.sum(out_x)

    total_dist = num_classes * featsq_sum + batch * cent_sq_total - 2.0 * cross_sum
    repel_sum = total_dist - attract_sum

    denom = jnp.float32(batch if size_average else 1)
    loss_attract = attract_sum / 2.0 / denom
    loss_repel = jnp.clip(margin - repel_sum / jnp.float32(batch * num_classes),
                          0.0, 1e6)
    return loss_attract + 0.01 * loss_repel


def _reference_loss(feat, label, centroids, size_average=True, margin=10.0):
    """Pure-JAX f32 mirror of the PyTorch forward, for verification."""
    B = feat.shape[0]
    f = feat.reshape(B, -1).astype(jnp.float32)
    c = centroids.astype(jnp.float32)
    C = c.shape[0]
    cb = c[label]
    la = jnp.sum((f - cb) ** 2) / 2.0 / (B if size_average else 1)
    dist = (jnp.sum(f * f, axis=1, keepdims=True)
            + jnp.sum(c * c, axis=1)[None, :]
            - 2.0 * f @ c.T)
    mask = label[:, None] == jnp.arange(C)[None, :]
    dist = jnp.where(mask, 0.0, dist)
    lr = jnp.clip(margin - jnp.sum(dist) / (B * C), 0.0, 1e6)
    return la + 0.01 * lr


if __name__ == "__main__":
    # Small shapes consistent with the module: feat is NCHW, flattened inside
    # the loss to (batch, feat_dim).
    batch, ch, h, w = 8, 8, 4, 4          # feat_dim = 8*4*4 = 128
    num_classes = 8
    feat_dim = ch * h * w

    key = jax.random.PRNGKey(0)
    k_feat, k_lab, k_cent = jax.random.split(key, 3)

    feat = jax.random.normal(k_feat, (batch, ch, h, w), dtype=jnp.float32)
    label = jax.random.randint(k_lab, (batch,), 0, num_classes, dtype=jnp.int32)
    centroids = 0.1 * jax.random.normal(k_cent, (num_classes, feat_dim),
                                        dtype=jnp.float32)

    # Case 1: large distances (repel margin clamps to 0).
    loss = jax.block_until_ready(disc_centroids_loss(feat, label, centroids))
    ref = jax.block_until_ready(_reference_loss(feat, label, centroids))
    assert jnp.allclose(loss, ref, rtol=2e-3, atol=2e-3), (loss, ref)

    # Case 2: small distances so the repel margin term is active.
    feat_small = 0.1 * feat
    loss2 = jax.block_until_ready(disc_centroids_loss(feat_small, label, centroids))
    ref2 = jax.block_until_ready(_reference_loss(feat_small, label, centroids))
    assert jnp.allclose(loss2, ref2, rtol=2e-3, atol=2e-3), (loss2, ref2)

    print("KERNEL_OK")
</pallas_src>

<mosaic_0001>
module attributes {stable_mosaic.version = 11 : i64} {
  func.func @_disc_centroids_kernel(%arg0: i32, %arg1: i32, %arg2: memref<8x128xf32, #tpu.memory_space<vmem>>, %arg3: memref<8x128xf32, #tpu.memory_space<vmem>>, %arg4: memref<128x128xbf16, #tpu.memory_space<vmem>>, %arg5: memref<1x8x128xf32, #tpu.memory_space<vmem>>, %arg6: memref<1x8x128xf32, #tpu.memory_space<vmem>>, %arg7: memref<1x8x128xf32, #tpu.memory_space<vmem>>) attributes {dimension_semantics = [#tpu.dimension_semantics<parallel>, #tpu.dimension_semantics<arbitrary>], iteration_bounds = array<i64: 1, 1>, scalar_prefetch = 0 : i64, scratch_operands = 0 : i64, tpu.core_type = #tpu.core_type<tc>, window_params = [{transform_indices = @transform_0, window_bounds = array<i64: 8, 128>}, {transform_indices = @transform_1, window_bounds = array<i64: 8, 128>}, {pipeline_mode = #tpu.pipeline_mode<synchronous>, transform_indices = @transform_2, window_bounds = array<i64: 128, 128>}, {transform_indices = @transform_3, window_bounds = array<i64: 1, 8, 128>}, {transform_indices = @transform_4, window_bounds = array<i64: 1, 8, 128>}, {transform_indices = @transform_5, window_bounds = array<i64: 1, 8, 128>}]} {
    %c0_i32 = arith.constant 0 : i32
    %0 = arith.cmpi eq, %arg1, %c0_i32 : i32
    %1 = arith.extui %0 : i1 to i32
    %c0_i32_0 = arith.constant 0 : i32
    %2 = arith.cmpi ne, %1, %c0_i32_0 : i32
    scf.if %2 {
      %cst_31 = arith.constant 0.000000e+00 : f32
      %34 = vector.broadcast %cst_31 : f32 to vector<1x8x128xf32>
      %c0_32 = arith.constant 0 : index
      %c0_33 = arith.constant 0 : index
      %c0_34 = arith.constant 0 : index
      %35 = vector.load %arg5[%c0_32, %c0_33, %c0_34] : memref<1x8x128xf32, #tpu.memory_space<vmem>>, vector<1x8x128xf32>
      tpu.vector_store %arg5[%c0_32, %c0_33, %c0_34], %34 {strides = array<i32>} : memref<1x8x128xf32, #tpu.memory_space<vmem>>, vector<1x8x128xf32>,
      %cst_35 = arith.constant 0.000000e+00 : f32
      %36 = vector.broadcast %cst_35 : f32 to vector<1x8x128xf32>
      %c0_36 = arith.constant 0 : index
      %c0_37 = arith.constant 0 : index
      %c0_38 = arith.constant 0 : index
      %37 = vector.load %arg6[%c0_36, %c0_37, %c0_38] : memref<1x8x128xf32, #tpu.memory_space<vmem>>, vector<1x8x128xf32>
      tpu.vector_store %arg6[%c0_36, %c0_37, %c0_38], %36 {strides = array<i32>} : memref<1x8x128xf32, #tpu.memory_space<vmem>>, vector<1x8x128xf32>,
      %cst_39 = arith.constant 0.000000e+00 : f32
      %38 = vector.broadcast %cst_39 : f32 to vector<1x8x128xf32>
      %c0_40 = arith.constant 0 : index
      %c0_41 = arith.constant 0 : index
      %c0_42 = arith.constant 0 : index
      %39 = vector.load %arg7[%c0_40, %c0_41, %c0_42] : memref<1x8x128xf32, #tpu.memory_space<vmem>>, vector<1x8x128xf32>
      tpu.vector_store %arg7[%c0_40, %c0_41, %c0_42], %38 {strides = array<i32>} : memref<1x8x128xf32, #tpu.memory_space<vmem>>, vector<1x8x128xf32>,
    } else {
    }
    %c0 = arith.constant 0 : index
    %c0_1 = arith.constant 0 : index
    %3 = vector.load %arg2[%c0, %c0_1] : memref<8x128xf32, #tpu.memory_space<vmem>>, vector<8x128xf32>
    %c0_2 = arith.constant 0 : index
    %c0_3 = arith.constant 0 : index
    %4 = vector.load %arg3[%c0_2, %c0_3] : memref<8x128xf32, #tpu.memory_space<vmem>>, vector<8x128xf32>
    %5 = arith.subf %3, %4 : vector<8x128xf32>
    %c0_4 = arith.constant 0 : index
    %c0_5 = arith.constant 0 : index
    %c0_6 = arith.constant 0 : index
    %6 = vector.load %arg5[%c0_4, %c0_5, %c0_6] : memref<1x8x128xf32, #tpu.memory_space<vmem>>, vector<1x8x128xf32>
    %7 = arith.mulf %5, %5 : vector<8x128xf32>
    %8 = vector.shape_cast %7 : vector<8x128xf32> to vector<1x8x1x128xf32>
    %cst = arith.constant dense<0.000000e+00> : vector<1x8x128xf32>
    %9 = vector.multi_reduction <add>, %8, %cst [2] : vector<1x8x1x128xf32> to vector<1x8x128xf32>
    %cst_7 = arith.constant dense<0.000000e+00> : vector<8x128xf32>
    %10 = vector.multi_reduction <add>, %9, %cst_7 [0] : vector<1x8x128xf32> to vector<8x128xf32>
    %11 = vector.shape_cast %10 : vector<8x128xf32> to vector<1x8x128xf32>
    %12 = arith.addf %6, %11 : vector<1x8x128xf32>
    %c0_8 = arith.constant 0 : index
    %c0_9 = arith.constant 0 : index
    %c0_10 = arith.constant 0 : index
    %13 = vector.load %arg5[%c0_8, %c0_9, %c0_10] : memref<1x8x128xf32, #tpu.memory_space<vmem>>, vector<1x8x128xf32>
    tpu.vector_store %arg5[%c0_8, %c0_9, %c0_10], %12 {strides = array<i32>} : memref<1x8x128xf32, #tpu.memory_space<vmem>>, vector<1x8x128xf32>,
    %c0_11 = arith.constant 0 : index
    %c0_12 = arith.constant 0 : index
    %c0_13 = arith.constant 0 : index
    %14 = vector.load %arg6[%c0_11, %c0_12, %c0_13] : memref<1x8x128xf32, #tpu.memory_space<vmem>>, vector<1x8x128xf32>
    %15 = arith.mulf %3, %3 : vector<8x128xf32>
    %16 = vector.shape_cast %15 : vector<8x128xf32> to vector<1x8x1x128xf32>
    %cst_14 = arith.constant dense<0.000000e+00> : vector<1x8x128xf32>
    %17 = vector.multi_reduction <add>, %16, %cst_14 [2] : vector<1x8x1x128xf32> to vector<1x8x128xf32>
    %cst_15 = arith.constant dense<0.000000e+00> : vector<8x128xf32>
    %18 = vector.multi_reduction <add>, %17, %cst_15 [0] : vector<1x8x128xf32> to vector<8x128xf32>
    %19 = vector.shape_cast %18 : vector<8x128xf32> to vector<1x8x128xf32>
    %20 = arith.addf %14, %19 : vector<1x8x128xf32>
    %c0_16 = arith.constant 0 : index
    %c0_17 = arith.constant 0 : index
    %c0_18 = arith.constant 0 : index
    %21 = vector.load %arg6[%c0_16, %c0_17, %c0_18] : memref<1x8x128xf32, #tpu.memory_space<vmem>>, vector<1x8x128xf32>
    tpu.vector_store %arg6[%c0_16, %c0_17, %c0_18], %20 {strides = array<i32>} : memref<1x8x128xf32, #tpu.memory_space<vmem>>, vector<1x8x128xf32>,
    %22 = arith.truncf %3 : vector<8x128xf32> to vector<8x128xbf16>
    %cst_19 = arith.constant 0.000000e+00 : f32
    %23 = vector.broadcast %cst_19 : f32 to vector<8x128xf32>
    %c0_20 = arith.constant 0 : index
    %c0_21 = arith.constant 0 : index
    %24 = vector.load %arg4[%c0_20, %c0_21] : memref<128x128xbf16, #tpu.memory_space<vmem>>, vector<128x128xbf16>
    %cst_22 = arith.constant dense<0.000000e+00> : vector<8x128xf32>
    %25 = tpu.matmul %22, %24, %cst_22 {dimension_numbers = #tpu.dot_dimension_numbers<[1], [0], [0], [1], [0, 0, 1, 1], [], []>} : vector<8x128xbf16>, vector<128x128xbf16>, vector<8x128xf32> -> vector<8x128xf32>
    %26 = vector.shape_cast %25 : vector<8x128xf32> to vector<1x8x1x128xf32>
    %cst_23 = arith.constant dense<0.000000e+00> : vector<1x8x128xf32>
    %27 = vector.multi_reduction <add>, %26, %cst_23 [2] : vector<1x8x1x128xf32> to vector<1x8x128xf32>
    %cst_24 = arith.constant dense<0.000000e+00> : vector<8x128xf32>
    %28 = vector.multi_reduction <add>, %27, %cst_24 [0] : vector<1x8x128xf32> to vector<8x128xf32>
    %29 = arith.addf %23, %28 : vector<8x128xf32>
    %c0_25 = arith.constant 0 : index
    %c0_26 = arith.constant 0 : index
    %c0_27 = arith.constant 0 : index
    %30 = vector.load %arg7[%c0_25, %c0_26, %c0_27] : memref<1x8x128xf32, #tpu.memory_space<vmem>>, vector<1x8x128xf32>
    %31 = vector.shape_cast %29 : vector<8x128xf32> to vector<1x8x128xf32>
    %32 = arith.addf %30, %31 : vector<1x8x128xf32>
    %c0_28 = arith.constant 0 : index
    %c0_29 = arith.constant 0 : index
    %c0_30 = arith.constant 0 : index
    %33 = vector.load %arg7[%c0_28, %c0_29, %c0_30] : memref<1x8x128xf32, #tpu.memory_space<vmem>>, vector<1x8x128xf32>
    tpu.vector_store %arg7[%c0_28, %c0_29, %c0_30], %32 {strides = array<i32>} : memref<1x8x128xf32, #tpu.memory_space<vmem>>, vector<1x8x128xf32>,
    return
  }
  func.func @transform_0(%arg0: i32, %arg1: i32) -> (i32, i32) {
    %c1_i32 = arith.constant 1 : i32
    %0 = arith.muli %arg0, %c1_i32 : i32
    %1 = arith.addi %0, %arg1 : i32
    %c0_i32 = arith.constant 0 : i32
    %c0_i32_0 = arith.constant 0 : i32
    return %1, %c0_i32 : i32, i32
  }
  func.func @transform_1(%arg0: i32, %arg1: i32) -> (i32, i32) {
    %c1_i32 = arith.constant 1 : i32
    %0 = arith.muli %arg0, %c1_i32 : i32
    %1 = arith.addi %0, %arg1 : i32
    %c0_i32 = arith.constant 0 : i32
    %c0_i32_0 = arith.constant 0 : i32
    return %1, %c0_i32 : i32, i32
  }
  func.func @transform_2(%arg0: i32, %arg1: i32) -> (i32, i32) {
    %c0_i32 = arith.constant 0 : i32
    %c0_i32_0 = arith.constant 0 : i32
    %c0_i32_1 = arith.constant 0 : i32
    return %c0_i32, %c0_i32_0 : i32, i32
  }
  func.func @transform_3(%arg0: i32, %arg1: i32) -> (i32, i32, i32) {
    %c0_i32 = arith.constant 0 : i32
    %c0_i32_0 = arith.constant 0 : i32
    %c0_i32_1 = arith.constant 0 : i32
    return %arg0, %c0_i32, %c0_i32_0 : i32, i32, i32
  }
  func.func @transform_4(%arg0: i32, %arg1: i32) -> (i32, i32, i32) {
    %c0_i32 = arith.constant 0 : i32
    %c0_i32_0 = arith.constant 0 : i32
    %c0_i32_1 = arith.constant 0 : i32
    return %arg0, %c0_i32, %c0_i32_0 : i32, i32, i32
  }
  func.func @transform_5(%arg0: i32, %arg1: i32) -> (i32, i32, i32) {
    %c0_i32 = arith.constant 0 : i32
    %c0_i32_0 = arith.constant 0 : i32
    %c0_i32_1 = arith.constant 0 : i32
    return %arg0, %c0_i32, %c0_i32_0 : i32, i32, i32
  }
}

module attributes {stable_mosaic.version = 11 : i64} {
  func.func @_disc_centroids_kernel(%arg0: i32, %arg1: i32, %arg2: memref<8x128xf32, #tpu.memory_space<vmem>>, %arg3: memref<8x128xf32, #tpu.memory_space<vmem>>, %arg4: memref<128x128xbf16, #tpu.memory_space<vmem>>, %arg5: memref<1x8x128xf32, #tpu.memory_space<vmem>>, %arg6: memref<1x8x128xf32, #tpu.memory_space<vmem>>, %arg7: memref<1x8x128xf32, #tpu.memory_space<vmem>>) attributes {dimension_semantics = [#tpu.dimension_semantics<parallel>, #tpu.dimension_semantics<arbitrary>], iteration_bounds = array<i64: 1, 1>, scalar_prefetch = 0 : i64, scratch_operands = 0 : i64, tpu.core_type = #tpu.core_type<tc>, window_params = [{transform_indices = @transform_0, window_bounds = array<i64: 8, 128>}, {transform_indices = @transform_1, window_bounds = array<i64: 8, 128>}, {pipeline_mode = #tpu.pipeline_mode<synchronous>, transform_indices = @transform_2, window_bounds = array<i64: 128, 128>}, {transform_indices = @transform_3, window_bounds = array<i64: 1, 8, 128>}, {transform_indices = @transform_4, window_bounds = array<i64: 1, 8, 128>}, {transform_indices = @transform_5, window_bounds = array<i64: 1, 8, 128>}]} {
    %c0_i32 = arith.constant 0 : i32
    %0 = arith.cmpi eq, %arg1, %c0_i32 : i32
    %1 = arith.extui %0 : i1 to i32
    %c0_i32_0 = arith.constant 0 : i32
    %2 = arith.cmpi ne, %1, %c0_i32_0 : i32
    scf.if %2 {
      %cst_31 = arith.constant 0.000000e+00 : f32
      %34 = vector.broadcast %cst_31 : f32 to vector<1x8x128xf32>
      %c0_32 = arith.constant 0 : index
      %c0_33 = arith.constant 0 : index
      %c0_34 = arith.constant 0 : index
      %35 = vector.load %arg5[%c0_32, %c0_33, %c0_34] : memref<1x8x128xf32, #tpu.memory_space<vmem>>, vector<1x8x128xf32>
      tpu.vector_store %arg5[%c0_32, %c0_33, %c0_34], %34 {strides = array<i32>} : memref<1x8x128xf32, #tpu.memory_space<vmem>>, vector<1x8x128xf32>,
      %cst_35 = arith.constant 0.000000e+00 : f32
      %36 = vector.broadcast %cst_35 : f32 to vector<1x8x128xf32>
      %c0_36 = arith.constant 0 : index
      %c0_37 = arith.constant 0 : index
      %c0_38 = arith.constant 0 : index
      %37 = vector.load %arg6[%c0_36, %c0_37, %c0_38] : memref<1x8x128xf32, #tpu.memory_space<vmem>>, vector<1x8x128xf32>
      tpu.vector_store %arg6[%c0_36, %c0_37, %c0_38], %36 {strides = array<i32>} : memref<1x8x128xf32, #tpu.memory_space<vmem>>, vector<1x8x128xf32>,
      %cst_39 = arith.constant 0.000000e+00 : f32
      %38 = vector.broadcast %cst_39 : f32 to vector<1x8x128xf32>
      %c0_40 = arith.constant 0 : index
      %c0_41 = arith.constant 0 : index
      %c0_42 = arith.constant 0 : index
      %39 = vector.load %arg7[%c0_40, %c0_41, %c0_42] : memref<1x8x128xf32, #tpu.memory_space<vmem>>, vector<1x8x128xf32>
      tpu.vector_store %arg7[%c0_40, %c0_41, %c0_42], %38 {strides = array<i32>} : memref<1x8x128xf32, #tpu.memory_space<vmem>>, vector<1x8x128xf32>,
    } else {
    }
    %c0 = arith.constant 0 : index
    %c0_1 = arith.constant 0 : index
    %3 = vector.load %arg2[%c0, %c0_1] : memref<8x128xf32, #tpu.memory_space<vmem>>, vector<8x128xf32>
    %c0_2 = arith.constant 0 : index
    %c0_3 = arith.constant 0 : index
    %4 = vector.load %arg3[%c0_2, %c0_3] : memref<8x128xf32, #tpu.memory_space<vmem>>, vector<8x128xf32>
    %5 = arith.subf %3, %4 : vector<8x128xf32>
    %c0_4 = arith.constant 0 : index
    %c0_5 = arith.constant 0 : index
    %c0_6 = arith.constant 0 : index
    %6 = vector.load %arg5[%c0_4, %c0_5, %c0_6] : memref<1x8x128xf32, #tpu.memory_space<vmem>>, vector<1x8x128xf32>
    %7 = arith.mulf %5, %5 : vector<8x128xf32>
    %8 = vector.shape_cast %7 : vector<8x128xf32> to vector<1x8x1x128xf32>
    %cst = arith.constant dense<0.000000e+00> : vector<1x8x128xf32>
    %9 = vector.multi_reduction <add>, %8, %cst [2] : vector<1x8x1x128xf32> to vector<1x8x128xf32>
    %cst_7 = arith.constant dense<0.000000e+00> : vector<8x128xf32>
    %10 = vector.multi_reduction <add>, %9, %cst_7 [0] : vector<1x8x128xf32> to vector<8x128xf32>
    %11 = vector.shape_cast %10 : vector<8x128xf32> to vector<1x8x128xf32>
    %12 = arith.addf %6, %11 : vector<1x8x128xf32>
    %c0_8 = arith.constant 0 : index
    %c0_9 = arith.constant 0 : index
    %c0_10 = arith.constant 0 : index
    %13 = vector.load %arg5[%c0_8, %c0_9, %c0_10] : memref<1x8x128xf32, #tpu.memory_space<vmem>>, vector<1x8x128xf32>
    tpu.vector_store %arg5[%c0_8, %c0_9, %c0_10], %12 {strides = array<i32>} : memref<1x8x128xf32, #tpu.memory_space<vmem>>, vector<1x8x128xf32>,
    %c0_11 = arith.constant 0 : index
    %c0_12 = arith.constant 0 : index
    %c0_13 = arith.constant 0 : index
    %14 = vector.load %arg6[%c0_11, %c0_12, %c0_13] : memref<1x8x128xf32, #tpu.memory_space<vmem>>, vector<1x8x128xf32>
    %15 = arith.mulf %3, %3 : vector<8x128xf32>
    %16 = vector.shape_cast %15 : vector<8x128xf32> to vector<1x8x1x128xf32>
    %cst_14 = arith.constant dense<0.000000e+00> : vector<1x8x128xf32>
    %17 = vector.multi_reduction <add>, %16, %cst_14 [2] : vector<1x8x1x128xf32> to vector<1x8x128xf32>
    %cst_15 = arith.constant dense<0.000000e+00> : vector<8x128xf32>
    %18 = vector.multi_reduction <add>, %17, %cst_15 [0] : vector<1x8x128xf32> to vector<8x128xf32>
    %19 = vector.shape_cast %18 : vector<8x128xf32> to vector<1x8x128xf32>
    %20 = arith.addf %14, %19 : vector<1x8x128xf32>
    %c0_16 = arith.constant 0 : index
    %c0_17 = arith.constant 0 : index
    %c0_18 = arith.constant 0 : index
    %21 = vector.load %arg6[%c0_16, %c0_17, %c0_18] : memref<1x8x128xf32, #tpu.memory_space<vmem>>, vector<1x8x128xf32>
    tpu.vector_store %arg6[%c0_16, %c0_17, %c0_18], %20 {strides = array<i32>} : memref<1x8x128xf32, #tpu.memory_space<vmem>>, vector<1x8x128xf32>,
    %22 = arith.truncf %3 : vector<8x128xf32> to vector<8x128xbf16>
    %cst_19 = arith.constant 0.000000e+00 : f32
    %23 = vector.broadcast %cst_19 : f32 to vector<8x128xf32>
    %c0_20 = arith.constant 0 : index
    %c0_21 = arith.constant 0 : index
    %24 = vector.load %arg4[%c0_20, %c0_21] : memref<128x128xbf16, #tpu.memory_space<vmem>>, vector<128x128xbf16>
    %cst_22 = arith.constant dense<0.000000e+00> : vector<8x128xf32>
    %25 = tpu.matmul %22, %24, %cst_22 {dimension_numbers = #tpu.dot_dimension_numbers<[1], [0], [0], [1], [0, 0, 1, 1], [], []>} : vector<8x128xbf16>, vector<128x128xbf16>, vector<8x128xf32> -> vector<8x128xf32>
    %26 = vector.shape_cast %25 : vector<8x128xf32> to vector<1x8x1x128xf32>
    %cst_23 = arith.constant dense<0.000000e+00> : vector<1x8x128xf32>
    %27 = vector.multi_reduction <add>, %26, %cst_23 [2] : vector<1x8x1x128xf32> to vector<1x8x128xf32>
    %cst_24 = arith.constant dense<0.000000e+00> : vector<8x128xf32>
    %28 = vector.multi_reduction <add>, %27, %cst_24 [0] : vector<1x8x128xf32> to vector<8x128xf32>
    %29 = arith.addf %23, %28 : vector<8x128xf32>
    %c0_25 = arith.constant 0 : index
    %c0_26 = arith.constant 0 : index
    %c0_27 = arith.constant 0 : index
    %30 = vector.load %arg7[%c0_25, %c0_26, %c0_27] : memref<1x8x128xf32, #tpu.memory_space<vmem>>, vector<1x8x128xf32>
    %31 = vector.shape_cast %29 : vector<8x128xf32> to vector<1x8x128xf32>
    %32 = arith.addf %30, %31 : vector<1x8x128xf32>
    %c0_28 = arith.constant 0 : index
    %c0_29 = arith.constant 0 : index
    %c0_30 = arith.constant 0 : index
    %33 = vector.load %arg7[%c0_28, %c0_29, %c0_30] : memref<1x8x128xf32, #tpu.memory_space<vmem>>, vector<1x8x128xf32>
    tpu.vector_store %arg7[%c0_28, %c0_29, %c0_30], %32 {strides = array<i32>} : memref<1x8x128xf32, #tpu.memory_space<vmem>>, vector<1x8x128xf32>,
    return
  }
  func.func @transform_0(%arg0: i32, %arg1: i32) -> (i32, i32) {
    %c1_i32 = arith.constant 1 : i32
    %0 = arith.muli %arg0, %c1_i32 : i32
    %1 = arith.addi %0, %arg1 : i32
    %c0_i32 = arith.constant 0 : i32
    %c0_i32_0 = arith.constant 0 : i32
    return %1, %c0_i32 : i32, i32
  }
  func.func @transform_1(%arg0: i32, %arg1: i32) -> (i32, i32) {
    %c1_i32 = arith.constant 1 : i32
    %0 = arith.muli %arg0, %c1_i32 : i32
    %1 = arith.addi %0, %arg1 : i32
    %c0_i32 = arith.constant 0 : i32
    %c0_i32_0 = arith.constant 0 : i32
    return %1, %c0_i32 : i32, i32
  }
  func.func @transform_2(%arg0: i32, %arg1: i32) -> (i32, i32) {
    %c0_i32 = arith.constant 0 : i32
    %c0_i32_0 = arith.constant 0 : i32
    %c0_i32_1 = arith.constant 0 : i32
    return %c0_i32, %c0_i32_0 : i32, i32
  }
  func.func @transform_3(%arg0: i32, %arg1: i32) -> (i32, i32, i32) {
    %c0_i32 = arith.constant 0 : i32
    %c0_i32_0 = arith.constant 0 : i32
    %c0_i32_1 = arith.constant 0 : i32
    return %arg0, %c0_i32, %c0_i32_0 : i32, i32, i32
  }
  func.func @transform_4(%arg0: i32, %arg1: i32) -> (i32, i32, i32) {
    %c0_i32 = arith.constant 0 : i32
    %c0_i32_0 = arith.constant 0 : i32
    %c0_i32_1 = arith.constant 0 : i32
    return %arg0, %c0_i32, %c0_i32_0 : i32, i32, i32
  }
  func.func @transform_5(%arg0: i32, %arg1: i32) -> (i32, i32, i32) {
    %c0_i32 = arith.constant 0 : i32
    %c0_i32_0 = arith.constant 0 : i32
    %c0_i32_1 = arith.constant 0 : i32
    return %arg0, %c0_i32, %c0_i32_0 : i32, i32, i32
  }
}

</mosaic_0001>

<bundles_post_ra>
// kernel: tpu_custom_call.1
= control target key start
LH: loop header
LB: loop body
LE: loop exit
PB: predicated region body
PF: predicated region fallthrough
CT: control target
= control target key end

     0   :  { %11 = vsyncpa [#allocation3], 0  ;;  %s548_s0 = inlined_call_operand.hbm [shape: f32[8,128], index: 0, kind: input, shape index: {}]   ;;  %s549_s1 = inlined_call_operand.hbm [shape: f32[8,128], index: 1, kind: input, shape index: {}]   ;;  %s550_s2 = inlined_call_operand.hbm [shape: bf16[128,128], index: 2, kind: input, shape index: {}]   ;;  %s551_s3 = inlined_call_operand.hbm [shape: f32[1,8,128], index: 3, kind: output, shape index: {0}]   ;;  %s552_s4 = inlined_call_operand.hbm [shape: f32[1,8,128], index: 4, kind: output, shape index: {1}]   ;;  %s553_s5 = inlined_call_operand.hbm [shape: f32[1,8,128], index: 5, kind: output, shape index: {2}]  }
   0x1   :  { %12 = vsyncpa [#allocation6], 0 }
   0x2   :  { %13 = vsyncpa [#allocation4], 0 }
   0x3   :  { %14 = vsyncpa [#allocation10], 0  ;;  %s436_s18 = smov [#allocation5]   ;;  %s437_s20 = smov [#allocation2]  }
   0x4   :  { %s37_s19 = sshll.u32 %s436_s18, 4  ;;  %s24_s21 = sshll.u32 %s437_s20, 4  ;;  %s38_s19 = int_to_ptr.vmem [resolvable:$true] %s37_s19  ;;  %s25_s21 = int_to_ptr.vmem [resolvable:$true] %s24_s21 }
   0x5   :  { %s296_s24 = scalar_lea.hbm %s549_s1, 128 }
   0x6   :  { %p297_p0 = scmp.ne.s32.totalorder %s549_s1, %s296_s24  ;;  %p300_p1 = scmp.lt.u32.totalorder %s296_s24, %s549_s1 }
   0x8   :  { %p302_p2 = pnand %p300_p1, %p297_p0 }
   0xa   :  { %305 = shalt.err (!%p302_p2)
}
   0xb   :  { %s306_s29 = scalar_lea.vmem %s38_s19, 128  ;;  %p311_p4 = scmp.lt.s32.totalorder %s38_s19, %s38_s19 }
   0xc   :  { %p307_p3 = scmp.ne.s32.totalorder %s38_s19, %s306_s29  ;;  %p312_p5 = scmp.lt.s32.totalorder %s306_s29, %s306_s29 }
   0xe   :  { %p313_p6 = por %p312_p5, %p311_p4 }
  0x10   :  { %p314_p7 = pnand %p313_p6, %p307_p3 }
  0x12   :  { %317 = shalt.err (!%p314_p7)
}
  0x13   :  { %40 = dma.hbm_to_vmem [thread:$0]  %s549_s1, 128, %s38_s19, [#allocation6]  }
  0x14   :  { %s318_s9 = scalar_lea.hbm %s548_s0, 128 }
  0x15   :  { %p319_p8 = scmp.ne.s32.totalorder %s548_s0, %s318_s9  ;;  %p322_p9 = scmp.lt.u32.totalorder %s318_s9, %s548_s0 }
  0x17   :  { %p324_p10 = pnand %p322_p9, %p319_p8 }
  0x19   :  { %327 = shalt.err (!%p324_p10)
}
  0x1a   :  { %s328_s14 = scalar_lea.vmem %s25_s21, 128  ;;  %p333_p12 = scmp.lt.s32.totalorder %s25_s21, %s25_s21 }
  0x1b   :  { %p329_p11 = scmp.ne.s32.totalorder %s25_s21, %s328_s14  ;;  %p334_p13 = scmp.lt.s32.totalorder %s328_s14, %s328_s14 }
  0x1d   :  { %p335_p0 = por %p334_p13, %p333_p12 }
  0x1f   :  { %p336_p1 = pnand %p335_p0, %p329_p11 }
  0x21   :  { %339 = shalt.err (!%p336_p1)
}
  0x22   :  { %27 = dma.hbm_to_vmem [thread:$0]  %s548_s0, 128, %s25_s21, [#allocation3]  }
  0x23   :  { %s438_s16 = smov [#allocation7]   ;;  %s340_s20 = scalar_lea.hbm %s550_s2, 1024 }
  0x24   :  { %s46_s17 = sshll.u32 %s438_s16, 4  ;;  %p341_p2 = scmp.ne.s32.totalorder %s550_s2, %s340_s20  ;;  %s47_s17 = int_to_ptr.vmem [resolvable:$true] %s46_s17 }
  0x25   :  { %p344_p3 = scmp.lt.u32.totalorder %s340_s20, %s550_s2 }
  0x27   :  { %p346_p4 = pnand %p344_p3, %p341_p2 }
  0x29   :  { %349 = shalt.err (!%p346_p4)
}
  0x2a   :  { %s350_s26 = scalar_lea.vmem %s47_s17, 1024  ;;  %p355_p6 = scmp.lt.s32.totalorder %s47_s17, %s47_s17 }
  0x2b   :  { %p351_p5 = scmp.ne.s32.totalorder %s47_s17, %s350_s26  ;;  %p356_p7 = scmp.lt.s32.totalorder %s350_s26, %s350_s26 }
  0x2d   :  { %p357_p8 = por %p356_p7, %p355_p6 }
  0x2f   :  { %p358_p9 = pnand %p357_p8, %p351_p5 }
  0x31   :  { %361 = shalt.err (!%p358_p9)
}
  0x32   :  { %s439_s0 = smov 64   ;;  %s440_s21 = smov 4  }
  0x33   :  { %52 = dma.hbm_to_vmem [thread:$0]  %s550_s2, 1024, %s47_s17, [#allocation6], %s439_s0, %s439_s0, %s440_s21  }
  0x34   :  { %428 = dma.done.wait [#allocation3], 128  }
  0x35   :  { %429 = vsyncadd [#allocation3], 4294967168 }
  0x36   :  { %430 = dma.done.wait [#allocation6], 1152  }
  0x37   :  { %431 = vsyncadd [#allocation6], 4294966144  ;;  %v441_v0 = vmov 0.0   ;;  %vm442_vm0 = vmmov 0   ;;  %v288_v1 = vld [vmem:[#allocation7] sm:$0xff]   ;;  %v289_v2 = vld [vmem:[#allocation7 + $0x8] sm:$0xff]  }
  0x38   :  { %258 = vmatprep.subr.bf16.mxu0 %v441_v0  ;;  %274 = vmatprep.mubr.msk.bf16.mxu0 %vm442_vm0, %v441_v0  ;;  %v290_v3 = vld [vmem:[#allocation7 + $0x10] sm:$0xff]   ;;  %v291_v4 = vld [vmem:[#allocation7 + $0x18] sm:$0xff]   ;;  %v292_v5 = vld [vmem:[#allocation7 + $0x20] sm:$0xff]   ;;  %s443_s2 = smov [#allocation9]   ;;  %s444_s30 = smov [#allocation8]  }
  0x39   :  { %259 = vmatpush3.bf16.msra.mxu0 %v288_v1  ;;  %v293_v6 = vld [vmem:[#allocation7 + $0x28] sm:$0xff]   ;;  %v294_v7 = vld [vmem:[#allocation7 + $0x30] sm:$0xff]   ;;  %v295_v8 = vld [vmem:[#allocation7 + $0x38] sm:$0xff]   ;;  %s214_s29 = sshll.u32 %s443_s2, 4  ;;  %s204_s6 = sshll.u32 %s444_s30, 4  ;;  %s215_s29 = int_to_ptr.vmem [resolvable:$true] %s214_s29  ;;  %s205_s6 = int_to_ptr.vmem [resolvable:$true] %s204_s6 }
  0x3a   :  { %260 = vmatprep.subr.bf16.mxu0 %v441_v0  ;;  %v72_v9 = vld [vmem:[#allocation2] sm:$0xff]  ;;  %v73_v11 = vld [vmem:[#allocation5] sm:$0xff]  ;;  %s362_s7 = scalar_lea.vmem %s215_s29, 128  ;;  %p367_p11 = scmp.lt.s32.totalorder %s215_s29, %s215_s29 }
  0x3b   :  { %v87_v10 = vpack.c.bf16 %v72_v9, %v72_v9  ;;  %v74_v12 = vsub.f32 %v72_v9, %v73_v11  ;;  %v82_v13 = vmul.f32 %v72_v9, %v72_v9  ;;  %p363_p10 = scmp.ne.s32.totalorder %s215_s29, %s362_s7  ;;  %p368_p12 = scmp.lt.s32.totalorder %s362_s7, %s362_s7 }
  0x3d   :  { %261 = vmatpush3.bf16.msra.mxu0 %v289_v2  ;;  %v76_v14 = vmul.f32 %v74_v12, %v74_v12  ;;  %86 = vst [vmem:[#allocation9] sm:$0xff] %v82_v13  ;;  %p369_p13 = por %p368_p12, %p367_p11 }
  0x3e   :  { %262 = vmatprep.subr.bf16.mxu0 %v441_v0 }
  0x3f   :  { %p370_p0 = pnand %p369_p13, %p363_p10 }
  0x41   :  { %263 = vmatpush3.bf16.msra.mxu0 %v290_v3 }
  0x42   :  { %264 = vmatprep.subr.bf16.mxu0 %v441_v0 }
  0x45   :  { %265 = vmatpush3.bf16.msra.mxu0 %v291_v4 }
  0x46   :  { %266 = vmatprep.subr.bf16.mxu0 %v441_v0 }
  0x49   :  { %267 = vmatpush3.bf16.msra.mxu0 %v292_v5 }
  0x4a   :  { %268 = vmatprep.subr.bf16.mxu0 %v441_v0 }
  0x4d   :  { %269 = vmatpush3.bf16.msra.mxu0 %v293_v6 }
  0x4e   :  { %270 = vmatprep.subr.bf16.mxu0 %v441_v0 }
  0x51   :  { %271 = vmatpush3.bf16.msra.mxu0 %v294_v7 }
  0x52   :  { %272 = vmatprep.subr.bf16.mxu0 %v441_v0 }
  0x55   :  { %273 = vmatpush3.bf16.msra.mxu0 %v295_v8 }
  0x58   :  { %275 = vmatmul.mubr.bf16.vlgmr.msra.gmra.mrb[0].mxu0 %v87_v10 }
  0x59   :  { %373 = shalt.err (!%p370_p0)
}
  0x5a   :  { %s374_s10 = scalar_lea.hbm %s552_s4, 128 }
  0x5b   :  { %p375_p1 = scmp.ne.s32.totalorder %s552_s4, %s374_s10  ;;  %p378_p2 = scmp.lt.u32.totalorder %s374_s10, %s552_s4 }
  0x5d   :  { %p380_p3 = pnand %p378_p2, %p375_p1 }
  0x5f   :  { %383 = shalt.err (!%p380_p3)
}
  0x60   :  { %217 = dma.vmem_to_hbm [thread:$0]  %s215_s29, 128, %s552_s4, [#allocation10]   ;;  %80 = vst [vmem:[#allocation8] sm:$0xff] %v76_v14 }
  0x61   :  { %s384_s16 = scalar_lea.vmem %s205_s6, 128  ;;  %p389_p5 = scmp.lt.s32.totalorder %s205_s6, %s205_s6 }
  0x62   :  { %p385_p4 = scmp.ne.s32.totalorder %s205_s6, %s384_s16  ;;  %p390_p6 = scmp.lt.s32.totalorder %s384_s16, %s384_s16 }
  0x64   :  { %p391_p7 = por %p390_p6, %p389_p5 }
  0x66   :  { %p392_p8 = pnand %p391_p7, %p385_p4 }
  0x68   :  { %395 = shalt.err (!%p392_p8)
}
  0x69   :  { %s396_s19 = scalar_lea.hbm %s551_s3, 128 }
  0x6a   :  { %p397_p9 = scmp.ne.s32.totalorder %s551_s3, %s396_s19  ;;  %p400_p10 = scmp.lt.u32.totalorder %s396_s19, %s551_s3 }
  0x6c   :  { %p402_p11 = pnand %p400_p10, %p397_p9 }
  0x6e   :  { %405 = shalt.err (!%p402_p11)
}
  0x6f   :  { %207 = dma.vmem_to_hbm [thread:$0]  %s205_s6, 128, %s551_s3, [#allocation4]  }
  0x70   :  { %s445_s26 = smov [#allocation11]  }
  0x71   :  { %s224_s0 = sshll.u32 %s445_s26, 4  ;;  %s225_s0 = int_to_ptr.vmem [resolvable:$true] %s224_s0 }
  0x72   :  { %s406_s21 = scalar_lea.vmem %s225_s0, 128  ;;  %p411_p13 = scmp.lt.s32.totalorder %s225_s0, %s225_s0 }
  0x73   :  { %p407_p12 = scmp.ne.s32.totalorder %s225_s0, %s406_s21  ;;  %p412_p0 = scmp.lt.s32.totalorder %s406_s21, %s406_s21 }
  0x75   :  { %p413_p1 = por %p412_p0, %p411_p13 }
  0x77   :  { %p414_p2 = pnand %p413_p1, %p407_p12 }
 0x12b   :  { %v186_v15 = vpop.f32.mrb[0].mxu0 }
 0x12c   :  { %v276_v16 = vpop.f32.mrb[1].mxu0  ;;  %197 = vst [vmem:[#allocation11] sm:$0xff] %v186_v15 }
 0x12d   :  { %v189_v17 = vpop.f32.mrb[2].mxu0 }
 0x12e   :  { %v277_v18 = vpop.f32.mrb[3].mxu0 }
 0x12f   :  { %417 = shalt.err (!%p414_p2)
}
 0x130   :  { %s418_s2 = scalar_lea.hbm %s553_s5, 128 }
 0x131   :  { %p419_p3 = scmp.ne.s32.totalorder %s553_s5, %s418_s2  ;;  %p422_p4 = scmp.lt.u32.totalorder %s418_s2, %s553_s5 }
 0x133   :  { %p424_p5 = pnand %p422_p4, %p419_p3 }
 0x135   :  { %427 = shalt.err (!%p424_p5)
}
 0x136   :  { %227 = dma.vmem_to_hbm [thread:$0]  %s225_s0, 128, %s553_s5, [#allocation10]  }
 0x137   :  { %432 = dma.done.wait [#allocation4], 128  }
 0x138   :  { %433 = vsyncadd [#allocation4], 4294967168 }
 0x139   :  { %434 = dma.done.wait [#allocation10], 256  }
 0x13a   :  { %435 = vsyncadd [#allocation10], 4294967040 }
 0x13b   :  { %237 = vsyncpa [#allocation3], 1 }
 0x13c   :  { %238 = vsyncpa [#allocation6], 1 }
 0x13d   :  { %239 = vsyncpa [#allocation4], 1 }
 0x13e   :  { %240 = vsyncpa [#allocation10], 1 }

// kernel: tpu_custom_call.1
= control target key start
LH: loop header
LB: loop body
LE: loop exit
PB: predicated region body
PF: predicated region fallthrough
CT: control target
= control target key end

     0   :  { %11 = vsyncpa [#allocation3], 0  ;;  %s548_s0 = inlined_call_operand.hbm [shape: f32[8,128], index: 0, kind: input, shape index: {}]   ;;  %s549_s1 = inlined_call_operand.hbm [shape: f32[8,128], index: 1, kind: input, shape index: {}]   ;;  %s550_s2 = inlined_call_operand.hbm [shape: bf16[128,128], index: 2, kind: input, shape index: {}]   ;;  %s551_s3 = inlined_call_operand.hbm [shape: f32[1,8,128], index: 3, kind: output, shape index: {0}]   ;;  %s552_s4 = inlined_call_operand.hbm [shape: f32[1,8,128], index: 4, kind: output, shape index: {1}]   ;;  %s553_s5 = inlined_call_operand.hbm [shape: f32[1,8,128], index: 5, kind: output, shape index: {2}]  }
   0x1   :  { %12 = vsyncpa [#allocation6], 0 }
   0x2   :  { %13 = vsyncpa [#allocation4], 0 }
   0x3   :  { %14 = vsyncpa [#allocation10], 0  ;;  %s436_s18 = smov [#allocation5]   ;;  %s437_s20 = smov [#allocation2]  }
   0x4   :  { %s37_s19 = sshll.u32 %s436_s18, 4  ;;  %s24_s21 = sshll.u32 %s437_s20, 4  ;;  %s38_s19 = int_to_ptr.vmem [resolvable:$true] %s37_s19  ;;  %s25_s21 = int_to_ptr.vmem [resolvable:$true] %s24_s21 }
   0x5   :  { %s296_s24 = scalar_lea.hbm %s549_s1, 128 }
   0x6   :  { %p297_p0 = scmp.ne.s32.totalorder %s549_s1, %s296_s24  ;;  %p300_p1 = scmp.lt.u32.totalorder %s296_s24, %s549_s1 }
   0x8   :  { %p302_p2 = pnand %p300_p1, %p297_p0 }
   0xa   :  { %305 = shalt.err (!%p302_p2)
}
   0xb   :  { %s306_s29 = scalar_lea.vmem %s38_s19, 128  ;;  %p311_p4 = scmp.lt.s32.totalorder %s38_s19, %s38_s19 }
   0xc   :  { %p307_p3 = scmp.ne.s32.totalorder %s38_s19, %s306_s29  ;;  %p312_p5 = scmp.lt.s32.totalorder %s306_s29, %s306_s29 }
   0xe   :  { %p313_p6 = por %p312_p5, %p311_p4 }
  0x10   :  { %p314_p7 = pnand %p313_p6, %p307_p3 }
  0x12   :  { %317 = shalt.err (!%p314_p7)
}
  0x13   :  { %40 = dma.hbm_to_vmem [thread:$0]  %s549_s1, 128, %s38_s19, [#allocation6]  }
  0x14   :  { %s318_s9 = scalar_lea.hbm %s548_s0, 128 }
  0x15   :  { %p319_p8 = scmp.ne.s32.totalorder %s548_s0, %s318_s9  ;;  %p322_p9 = scmp.lt.u32.totalorder %s318_s9, %s548_s0 }
  0x17   :  { %p324_p10 = pnand %p322_p9, %p319_p8 }
  0x19   :  { %327 = shalt.err (!%p324_p10)
}
  0x1a   :  { %s328_s14 = scalar_lea.vmem %s25_s21, 128  ;;  %p333_p12 = scmp.lt.s32.totalorder %s25_s21, %s25_s21 }
  0x1b   :  { %p329_p11 = scmp.ne.s32.totalorder %s25_s21, %s328_s14  ;;  %p334_p13 = scmp.lt.s32.totalorder %s328_s14, %s328_s14 }
  0x1d   :  { %p335_p0 = por %p334_p13, %p333_p12 }
  0x1f   :  { %p336_p1 = pnand %p335_p0, %p329_p11 }
  0x21   :  { %339 = shalt.err (!%p336_p1)
}
  0x22   :  { %27 = dma.hbm_to_vmem [thread:$0]  %s548_s0, 128, %s25_s21, [#allocation3]  }
  0x23   :  { %s438_s16 = smov [#allocation7]   ;;  %s340_s20 = scalar_lea.hbm %s550_s2, 1024 }
  0x24   :  { %s46_s17 = sshll.u32 %s438_s16, 4  ;;  %p341_p2 = scmp.ne.s32.totalorder %s550_s2, %s340_s20  ;;  %s47_s17 = int_to_ptr.vmem [resolvable:$true] %s46_s17 }
  0x25   :  { %p344_p3 = scmp.lt.u32.totalorder %s340_s20, %s550_s2 }
  0x27   :  { %p346_p4 = pnand %p344_p3, %p341_p2 }
  0x29   :  { %349 = shalt.err (!%p346_p4)
}
  0x2a   :  { %s350_s26 = scalar_lea.vmem %s47_s17, 1024  ;;  %p355_p6 = scmp.lt.s32.totalorder %s47_s17, %s47_s17 }
  0x2b   :  { %p351_p5 = scmp.ne.s32.totalorder %s47_s17, %s350_s26  ;;  %p356_p7 = scmp.lt.s32.totalorder %s350_s26, %s350_s26 }
  0x2d   :  { %p357_p8 = por %p356_p7, %p355_p6 }
  0x2f   :  { %p358_p9 = pnand %p357_p8, %p351_p5 }
  0x31   :  { %361 = shalt.err (!%p358_p9)
}
  0x32   :  { %s439_s0 = smov 64   ;;  %s440_s21 = smov 4  }
  0x33   :  { %52 = dma.hbm_to_vmem [thread:$0]  %s550_s2, 1024, %s47_s17, [#allocation6], %s439_s0, %s439_s0, %s440_s21  }
  0x34   :  { %428 = dma.done.wait [#allocation3], 128  }
  0x35   :  { %429 = vsyncadd [#allocation3], 4294967168 }
  0x36   :  { %430 = dma.done.wait [#allocation6], 1152  }
  0x37   :  { %431 = vsyncadd [#allocation6], 4294966144  ;;  %v441_v0 = vmov 0.0   ;;  %vm442_vm0 = vmmov 0   ;;  %v288_v1 = vld [vmem:[#allocation7] sm:$0xff]   ;;  %v289_v2 = vld [vmem:[#allocation7 + $0x8] sm:$0xff]  }
  0x38   :  { %258 = vmatprep.subr.bf16.mxu0 %v441_v0  ;;  %274 = vmatprep.mubr.msk.bf16.mxu0 %vm442_vm0, %v441_v0  ;;  %v290_v3 = vld [vmem:[#allocation7 + $0x10] sm:$0xff]   ;;  %v291_v4 = vld [vmem:[#allocation7 + $0x18] sm:$0xff]   ;;  %v292_v5 = vld [vmem:[#allocation7 + $0x20] sm:$0xff]   ;;  %s443_s2 = smov [#allocation9]   ;;  %s444_s30 = smov [#allocation8]  }
  0x39   :  { %259 = vmatpush3.bf16.msra.mxu0 %v288_v1  ;;  %v293_v6 = vld [vmem:[#allocation7 + $0x28] sm:$0xff]   ;;  %v294_v7 = vld [vmem:[#allocation7 + $0x30] sm:$0xff]   ;;  %v295_v8 = vld [vmem:[#allocation7 + $0x38] sm:$0xff]   ;;  %s214_s29 = sshll.u32 %s443_s2, 4  ;;  %s204_s6 = sshll.u32 %s444_s30, 4  ;;  %s215_s29 = int_to_ptr.vmem [resolvable:$true] %s214_s29  ;;  %s205_s6 = int_to_ptr.vmem [resolvable:$true] %s204_s6 }
  0x3a   :  { %260 = vmatprep.subr.bf16.mxu0 %v441_v0  ;;  %v72_v9 = vld [vmem:[#allocation2] sm:$0xff]  ;;  %v73_v11 = vld [vmem:[#allocation5] sm:$0xff]  ;;  %s362_s7 = scalar_lea.vmem %s215_s29, 128  ;;  %p367_p11 = scmp.lt.s32.totalorder %s215_s29, %s215_s29 }
  0x3b   :  { %v87_v10 = vpack.c.bf16 %v72_v9, %v72_v9  ;;  %v74_v12 = vsub.f32 %v72_v9, %v73_v11  ;;  %v82_v13 = vmul.f32 %v72_v9, %v72_v9  ;;  %p363_p10 = scmp.ne.s32.totalorder %s215_s29, %s362_s7  ;;  %p368_p12 = scmp.lt.s32.totalorder %s362_s7, %s362_s7 }
  0x3d   :  { %261 = vmatpush3.bf16.msra.mxu0 %v289_v2  ;;  %v76_v14 = vmul.f32 %v74_v12, %v74_v12  ;;  %86 = vst [vmem:[#allocation9] sm:$0xff] %v82_v13  ;;  %p369_p13 = por %p368_p12, %p367_p11 }
  0x3e   :  { %262 = vmatprep.subr.bf16.mxu0 %v441_v0 }
  0x3f   :  { %p370_p0 = pnand %p369_p13, %p363_p10 }
  0x41   :  { %263 = vmatpush3.bf16.msra.mxu0 %v290_v3 }
  0x42   :  { %264 = vmatprep.subr.bf16.mxu0 %v441_v0 }
  0x45   :  { %265 = vmatpush3.bf16.msra.mxu0 %v291_v4 }
  0x46   :  { %266 = vmatprep.subr.bf16.mxu0 %v441_v0 }
  0x49   :  { %267 = vmatpush3.bf16.msra.mxu0 %v292_v5 }
  0x4a   :  { %268 = vmatprep.subr.bf16.mxu0 %v441_v0 }
  0x4d   :  { %269 = vmatpush3.bf16.msra.mxu0 %v293_v6 }
  0x4e   :  { %270 = vmatprep.subr.bf16.mxu0 %v441_v0 }
  0x51   :  { %271 = vmatpush3.bf16.msra.mxu0 %v294_v7 }
  0x52   :  { %272 = vmatprep.subr.bf16.mxu0 %v441_v0 }
  0x55   :  { %273 = vmatpush3.bf16.msra.mxu0 %v295_v8 }
  0x58   :  { %275 = vmatmul.mubr.bf16.vlgmr.msra.gmra.mrb[0].mxu0 %v87_v10 }
  0x59   :  { %373 = shalt.err (!%p370_p0)
}
  0x5a   :  { %s374_s10 = scalar_lea.hbm %s552_s4, 128 }
  0x5b   :  { %p375_p1 = scmp.ne.s32.totalorder %s552_s4, %s374_s10  ;;  %p378_p2 = scmp.lt.u32.totalorder %s374_s10, %s552_s4 }
  0x5d   :  { %p380_p3 = pnand %p378_p2, %p375_p1 }
  0x5f   :  { %383 = shalt.err (!%p380_p3)
}
  0x60   :  { %217 = dma.vmem_to_hbm [thread:$0]  %s215_s29, 128, %s552_s4, [#allocation10]   ;;  %80 = vst [vmem:[#allocation8] sm:$0xff] %v76_v14 }
  0x61   :  { %s384_s16 = scalar_lea.vmem %s205_s6, 128  ;;  %p389_p5 = scmp.lt.s32.totalorder %s205_s6, %s205_s6 }
  0x62   :  { %p385_p4 = scmp.ne.s32.totalorder %s205_s6, %s384_s16  ;;  %p390_p6 = scmp.lt.s32.totalorder %s384_s16, %s384_s16 }
  0x64   :  { %p391_p7 = por %p390_p6, %p389_p5 }
  0x66   :  { %p392_p8 = pnand %p391_p7, %p385_p4 }
  0x68   :  { %395 = shalt.err (!%p392_p8)
}
  0x69   :  { %s396_s19 = scalar_lea.hbm %s551_s3, 128 }
  0x6a   :  { %p397_p9 = scmp.ne.s32.totalorder %s551_s3, %s396_s19  ;;  %p400_p10 = scmp.lt.u32.totalorder %s396_s19, %s551_s3 }
  0x6c   :  { %p402_p11 = pnand %p400_p10, %p397_p9 }
  0x6e   :  { %405 = shalt.err (!%p402_p11)
}
  0x6f   :  { %207 = dma.vmem_to_hbm [thread:$0]  %s205_s6, 128, %s551_s3, [#allocation4]  }
  0x70   :  { %s445_s26 = smov [#allocation11]  }
  0x71   :  { %s224_s0 = sshll.u32 %s445_s26, 4  ;;  %s225_s0 = int_to_ptr.vmem [resolvable:$true] %s224_s0 }
  0x72   :  { %s406_s21 = scalar_lea.vmem %s225_s0, 128  ;;  %p411_p13 = scmp.lt.s32.totalorder %s225_s0, %s225_s0 }
  0x73   :  { %p407_p12 = scmp.ne.s32.totalorder %s225_s0, %s406_s21  ;;  %p412_p0 = scmp.lt.s32.totalorder %s406_s21, %s406_s21 }
  0x75   :  { %p413_p1 = por %p412_p0, %p411_p13 }
  0x77   :  { %p414_p2 = pnand %p413_p1, %p407_p12 }
 0x12b   :  { %v186_v15 = vpop.f32.mrb[0].mxu0 }
 0x12c   :  { %v276_v16 = vpop.f32.mrb[1].mxu0  ;;  %197 = vst [vmem:[#allocation11] sm:$0xff] %v186_v15 }
 0x12d   :  { %v189_v17 = vpop.f32.mrb[2].mxu0 }
 0x12e   :  { %v277_v18 = vpop.f32.mrb[3].mxu0 }
 0x12f   :  { %417 = shalt.err (!%p414_p2)
}
 0x130   :  { %s418_s2 = scalar_lea.hbm %s553_s5, 128 }
 0x131   :  { %p419_p3 = scmp.ne.s32.totalorder %s553_s5, %s418_s2  ;;  %p422_p4 = scmp.lt.u32.totalorder %s418_s2, %s553_s5 }
 0x133   :  { %p424_p5 = pnand %p422_p4, %p419_p3 }
 0x135   :  { %427 = shalt.err (!%p424_p5)
}
 0x136   :  { %227 = dma.vmem_to_hbm [thread:$0]  %s225_s0, 128, %s553_s5, [#allocation10]  }
 0x137   :  { %432 = dma.done.wait [#allocation4], 128  }
 0x138   :  { %433 = vsyncadd [#allocation4], 4294967168 }
 0x139   :  { %434 = dma.done.wait [#allocation10], 256  }
 0x13a   :  { %435 = vsyncadd [#allocation10], 4294967040 }
 0x13b   :  { %237 = vsyncpa [#allocation3], 1 }
 0x13c   :  { %238 = vsyncpa [#allocation6], 1 }
 0x13d   :  { %239 = vsyncpa [#allocation4], 1 }
 0x13e   :  { %240 = vsyncpa [#allocation10], 1 }

</bundles_post_ra>
